<compile_context>
chip_gen: v7x
topology: tpu7x:2x2x1
jax: 0.10.0
libtpu: 0.0.40
codegen_flags: <defaults>
</compile_context>

<pallas_src>
import functools

import jax
import jax.numpy as jnp
from jax.experimental import pallas as pl
from jax.experimental.pallas import tpu as pltpu

BN_EPS = 1e-5
LANE = 128


def _round_up(x, m):
    return (x + m - 1) // m * m


def _default_vmem_limit():
    # 32 MiB is safe everywhere (v7x has 64 MiB physical VMEM); on 128-MiB parts
    # (v5e / v6e) raise the scoped limit so bigger blocks / deeper buffering fit.
    try:
        info = pltpu.get_tpu_info()
        cap = getattr(info, "vmem_capacity_bytes", 0) or 0
        if cap >= 100 * 1024 * 1024:
            return 64 * 1024 * 1024
    except Exception:
        pass
    return 32 * 1024 * 1024


VMEM_LIMIT = _default_vmem_limit()


def _compiler_params():
    return pltpu.CompilerParams(dimension_semantics=("parallel",),
                                vmem_limit_bytes=VMEM_LIMIT)


# --------------------------- canonical flat layout --------------------------- #
# Per image: rows r in [0, R).  Valid pixel (h, w) lives at r = G + (h+1)*Wp + (w+1)
# where Hp=H+2, Wp=W+2, P=Hp*Wp, G = guard rows (>= Wp+2, multiple of 16),
# R = round_up(2G + P, 16).  All non-valid rows are zero (or masked in-kernel).

def _geom(H, W):
    Hp, Wp = H + 2, W + 2
    G = _round_up(Wp + 2, 16)
    P = Hp * Wp
    R = _round_up(2 * G + P, 16)
    return Hp, Wp, G, P, R


def _to_canonical(img_nhwc, cpad):
    """(N, H, W, C) f32/bf16 -> (N, R, cpad) bf16 canonical flat layout."""
    N, H, W, C = img_nhwc.shape
    _, _, G, P, R = _geom(H, W)
    y = jnp.pad(img_nhwc, ((0, 0), (1, 1), (1, 1), (0, cpad - C)))
    y = y.reshape(N, P, cpad)
    y = jnp.pad(y, ((0, 0), (G, R - G - P), (0, 0)))
    return y.astype(jnp.bfloat16)


def _make_mask(H, W):
    """(R, 1) f32 mask: 1.0 at valid pixel rows, 0.0 at padding/guard rows."""
    _, _, G, P, R = _geom(H, W)
    m = jnp.pad(jnp.ones((H, W), jnp.float32), ((1, 1), (1, 1))).reshape(P)
    m = jnp.pad(m, (G, R - G - P))
    return m.reshape(R, 1)


def _from_canonical(out_can, H, W, cout):
    """(N, R, Cp) -> NCHW (N, cout, H, W), dropping guard/border rows + pad lanes."""
    Hp, Wp, G, P, _ = _geom(H, W)
    N = out_can.shape[0]
    y = out_can[:, G:G + P, :].reshape(N, Hp, Wp, -1)[:, 1:H + 1, 1:W + 1, :cout]
    return jnp.transpose(y, (0, 3, 1, 2))


def _pack_w3x3(w_oihw, cinp, coutp):
    """(cout, cin, 3, 3) -> (9, cinp, coutp) bf16, tap-major; w9[dy*3+dx][i,o]=w[o,i,dy,dx]."""
    cout, cin = w_oihw.shape[0], w_oihw.shape[1]
    wt = jnp.transpose(w_oihw, (2, 3, 1, 0))
    wt = jnp.pad(wt, ((0, 0), (0, 0), (0, cinp - cin), (0, coutp - cout)))
    return wt.reshape(9, cinp, coutp).astype(jnp.bfloat16)


def _pad2(a, rows, cols):
    return jnp.pad(a, ((0, rows - a.shape[0]), (0, cols - a.shape[1])))


# ----------------------------- Pallas kernels ------------------------------ #

def _conv3x3_s1_kernel(x_ref, w_ref, m_ref, scale_ref, shift_ref, y_ref, s_ref,
                       *scratch, G, Wp, P, apply_affine):
    """One grid step = one image.  9-tap accumulation over shifted contiguous row
    slices of the canonical flat image (in-kernel patch extraction).  Optionally
    fuses the previous BN's normalize+ReLU (scale/shift) into the input path.
    Emits pre-BN conv output (bf16) + per-image per-channel [sum, sum_sq] (f32)."""
    if apply_affine:
        a_ref, = scratch
        xv = x_ref[0].astype(jnp.float32)
        a = jnp.maximum(xv * scale_ref[...] + shift_ref[...], 0.0) * m_ref[...]
        a_ref[...] = a.astype(a_ref.dtype)

    def tap(t):
        dy, dx = t // 3, t % 3
        off = G + (dy - 1) * Wp + (dx - 1)          # static, in-bounds by construction
        if apply_affine:
            blk = a_ref[off:off + P, :]
        else:
            blk = x_ref[0, off:off + P, :]
        return jnp.dot(blk, w_ref[t], preferred_element_type=jnp.float32)

    acc = tap(0)
    for t in range(1, 9):
        acc = acc + tap(t)

    mm = m_ref[G:G + P, :]                          # exclude padding/junk rows from stats
    acc_m = acc * mm
    s_ref[0, 0:1, :] = jnp.sum(acc_m, axis=0, keepdims=True)
    s_ref[0, 1:2, :] = jnp.sum(acc_m * acc, axis=0, keepdims=True)

    y_ref[...] = jnp.zeros_like(y_ref)
    y_ref[0, G:G + P, :] = acc.astype(y_ref.dtype)


def _matmul_stats_kernel(p_ref, w_ref, y_ref, s_ref):
    """Stride-2 conv1 path: bf16 MXU matmul tile, bf16 output, f32 stats from acc."""
    acc = jnp.dot(p_ref[...], w_ref[...], preferred_element_type=jnp.float32)
    y_ref[...] = acc.astype(y_ref.dtype)
    s_ref[0, 0:1, :] = jnp.sum(acc, axis=0, keepdims=True)
    s_ref[0, 1:2, :] = jnp.sum(acc * acc, axis=0, keepdims=True)


def _bn_add_relu_kernel(y_ref, sc_ref, scale_ref, shift_ref, o_ref):
    a = jnp.maximum(y_ref[0].astype(jnp.float32) * scale_ref[...] + shift_ref[...], 0.0)
    o_ref[0] = jnp.maximum(sc_ref[0].astype(jnp.float32) + a, 0.0)


def _bn_conv1x1_add_relu_kernel(y_ref, xs_ref, w3_ref, b3_ref, scale_ref, shift_ref, o_ref):
    a = jnp.maximum(y_ref[0].astype(jnp.float32) * scale_ref[...] + shift_ref[...], 0.0)
    sc = jnp.dot(xs_ref[0], w3_ref[...], preferred_element_type=jnp.float32) + b3_ref[...]
    o_ref[0] = jnp.maximum(sc + a, 0.0)


# ------------------------------- wrappers ----------------------------------- #

def _conv3x3_s1(x_can, w9, mask, geom, scale=None, shift=None):
    _, Wp, G, P, R = geom
    N, Rx, Cin = x_can.shape
    assert Rx == R
    Cout = w9.shape[2]
    apply_affine = scale is not None
    if not apply_affine:
        scale = jnp.ones((1, Cin), jnp.float32)
        shift = jnp.zeros((1, Cin), jnp.float32)
    kernel = functools.partial(_conv3x3_s1_kernel, G=G, Wp=Wp, P=P,
                               apply_affine=apply_affine)
    scratch = [pltpu.VMEM((R, Cin), jnp.bfloat16)] if apply_affine else []
    y, s = pl.pallas_call(
        kernel,
        out_shape=(jax.ShapeDtypeStruct((N, R, Cout), jnp.bfloat16),
                   jax.ShapeDtypeStruct((N, 2, Cout), jnp.float32)),
        grid_spec=pltpu.PrefetchScalarGridSpec(
            num_scalar_prefetch=0,
            grid=(N,),
            in_specs=[pl.BlockSpec((1, R, Cin), lambda i: (i, 0, 0)),
                      pl.BlockSpec((9, Cin, Cout), lambda i: (0, 0, 0)),   # resident
                      pl.BlockSpec((R, 1), lambda i: (0, 0)),              # resident
                      pl.BlockSpec((1, Cin), lambda i: (0, 0)),            # resident
                      pl.BlockSpec((1, Cin), lambda i: (0, 0))],           # resident
            out_specs=(pl.BlockSpec((1, R, Cout), lambda i: (i, 0, 0)),
                       pl.BlockSpec((1, 2, Cout), lambda i: (i, 0, 0))),
            scratch_shapes=scratch),
        compiler_params=_compiler_params(),
    )(x_can, w9, mask, scale, shift)
    return y, jnp.sum(s, axis=0)


def _matmul_stats(p_bf16, w_bf16, tm):
    Mp, K = p_bf16.shape
    Cp = w_bf16.shape[1]
    nt = Mp // tm
    y, s = pl.pallas_call(
        _matmul_stats_kernel,
        out_shape=(jax.ShapeDtypeStruct((Mp, Cp), jnp.bfloat16),
                   jax.ShapeDtypeStruct((nt, 2, Cp), jnp.float32)),
        grid_spec=pltpu.PrefetchScalarGridSpec(
            num_scalar_prefetch=0,
            grid=(nt,),
            in_specs=[pl.BlockSpec((tm, K), lambda i: (i, 0)),
                      pl.BlockSpec((K, Cp), lambda i: (0, 0))],            # resident
            out_specs=(pl.BlockSpec((tm, Cp), lambda i: (i, 0)),
                       pl.BlockSpec((1, 2, Cp), lambda i: (i, 0, 0)))),
        compiler_params=_compiler_params(),
    )(p_bf16, w_bf16)
    return y, jnp.sum(s, axis=0)


def _bn_add_relu(y2, sc, scale, shift):
    N, R, Cp = y2.shape
    return pl.pallas_call(
        _bn_add_relu_kernel,
        out_shape=jax.ShapeDtypeStruct((N, R, Cp), jnp.float32),
        grid_spec=pltpu.PrefetchScalarGridSpec(
            num_scalar_prefetch=0,
            grid=(N,),
            in_specs=[pl.BlockSpec((1, R, Cp), lambda i: (i, 0, 0)),
                      pl.BlockSpec((1, R, Cp), lambda i: (i, 0, 0)),
                      pl.BlockSpec((1, Cp), lambda i: (0, 0)),
                      pl.BlockSpec((1, Cp), lambda i: (0, 0))],
            out_specs=pl.BlockSpec((1, R, Cp), lambda i: (i, 0, 0))),
        compiler_params=_compiler_params(),
    )(y2, sc, scale, shift)


def _bn_conv1x1_add_relu(y2, xs, w3, b3, scale, shift):
    N, R, Cp = y2.shape
    Cinp = xs.shape[2]
    return pl.pallas_call(
        _bn_conv1x1_add_relu_kernel,
        out_shape=jax.ShapeDtypeStruct((N, R, Cp), jnp.float32),
        grid_spec=pltpu.PrefetchScalarGridSpec(
            num_scalar_prefetch=0,
            grid=(N,),
            in_specs=[pl.BlockSpec((1, R, Cp), lambda i: (i, 0, 0)),
                      pl.BlockSpec((1, R, Cinp), lambda i: (i, 0, 0)),
                      pl.BlockSpec((Cinp, Cp), lambda i: (0, 0)),          # resident
                      pl.BlockSpec((1, Cp), lambda i: (0, 0)),             # resident
                      pl.BlockSpec((1, Cp), lambda i: (0, 0)),
                      pl.BlockSpec((1, Cp), lambda i: (0, 0))],
            out_specs=pl.BlockSpec((1, R, Cp), lambda i: (i, 0, 0))),
        compiler_params=_compiler_params(),
    )(y2, xs, w3, b3, scale, shift)


# --------------------------- plain-JAX glue --------------------------------- #

def _bn_scale_shift(stats, gamma, beta, count):
    """Fold training-mode BN into per-channel scale/shift (tiny XLA op)."""
    mean = stats[0:1, :] / count
    var = jnp.maximum(stats[1:2, :] / count - mean * mean, 0.0)
    rstd = jax.lax.rsqrt(var + BN_EPS)
    scale = gamma * rstd
    shift = beta - mean * scale
    return scale.astype(jnp.float32), shift.astype(jnp.float32)


def _im2col_3x3(x_nhwc, stride):
    """3x3/pad=1 patches -> (N*Ho*Wo, 9*C), tap-major / chan-minor (stride-2 path only)."""
    xp = jnp.pad(x_nhwc, ((0, 0), (1, 1), (1, 1), (0, 0)))
    N, Hp, Wp, C = xp.shape
    Ho = (Hp - 3) // stride + 1
    Wo = (Wp - 3) // stride + 1
    cols = []
    for dy in range(3):
        for dx in range(3):
            cols.append(xp[:, dy:dy + stride * Ho:stride, dx:dx + stride * Wo:stride, :])
    patches = jnp.concatenate(cols, axis=-1)
    return patches.reshape(N * Ho * Wo, 9 * C), (N, Ho, Wo)


def residual_block_forward(x_nchw, params, same_shape):
    stride = 1 if same_shape else 2
    x = jnp.transpose(x_nchw, (0, 2, 3, 1)).astype(jnp.float32)  # NHWC
    N, H, W, cin = x.shape
    cout = params["w1"].shape[0]
    Cp = _round_up(cout, LANE)
    Cinp = _round_up(cin, LANE)
    Ho, Wo = H // stride, W // stride
    m_count = float(N * Ho * Wo)

    g1 = _pad2(params["g1"].reshape(1, cout), 1, Cp)
    b1 = _pad2(params["b1"].reshape(1, cout), 1, Cp)
    g2 = _pad2(params["g2"].reshape(1, cout), 1, Cp)
    b2 = _pad2(params["b2"].reshape(1, cout), 1, Cp)

    geom_o = _geom(Ho, Wo)           # canonical layout of the block's output spatial size
    mask_o = _make_mask(Ho, Wo)

    if same_shape:
        # ---- conv1 (stride 1): in-kernel 9-tap conv on canonical layout ----
        x_can = _to_canonical(x, Cinp)                       # (N, R, Cinp) bf16
        w1_9 = _pack_w3x3(params["w1"], Cinp, Cp)
        y1, s1 = _conv3x3_s1(x_can, w1_9, mask_o, geom_o)    # pre-BN y1 bf16 + stats
    else:
        # ---- conv1 (stride 2): tiled im2col matmul (wrapper-side patch build) ----
        p1, _ = _im2col_3x3(x, stride)                       # (M, 9*cin)
        M = N * Ho * Wo
        tm = min(512, _round_up(M, 128))
        Mp = _round_up(M, tm)
        k1 = 9 * cin
        k1p = _round_up(k1, LANE)
        p1b = jnp.pad(p1, ((0, Mp - M), (0, k1p - k1))).astype(jnp.bfloat16)
        w1 = jnp.transpose(params["w1"], (2, 3, 1, 0)).reshape(k1, cout)
        w1b = _pad2(w1, k1p, Cp).astype(jnp.bfloat16)
        y1_flat, s1 = _matmul_stats(p1b, w1b, tm)            # bf16 (Mp, Cp)
        y1 = _to_canonical(y1_flat[:M].reshape(N, Ho, Wo, Cp), Cp)

    scale1, shift1 = _bn_scale_shift(s1, g1, b1, m_count)

    # ---- conv2 (stride 1), bn1 normalize + ReLU fused into its input path ----
    w2_9 = _pack_w3x3(params["w2"], Cp, Cp)
    y2, s2 = _conv3x3_s1(y1, w2_9, mask_o, geom_o, scale1, shift1)
    scale2, shift2 = _bn_scale_shift(s2, g2, b2, m_count)

    # ---- bn2 + ReLU + shortcut add + ReLU (fused epilogue) ----
    if same_shape:
        out_can = _bn_add_relu(y2, x_can, scale2, shift2)
    else:
        xs = x[:, ::stride, ::stride, :]                     # 1x1 stride-2 sampling
        xs_can = _to_canonical(xs, Cinp)
        w3 = _pad2(params["w3"][:, :, 0, 0].T, Cinp, Cp).astype(jnp.bfloat16)
        b3 = _pad2(params["b3"].reshape(1, cout), 1, Cp)
        out_can = _bn_conv1x1_add_relu(y2, xs_can, w3, b3, scale2, shift2)

    return _from_canonical(out_can, Ho, Wo, cout)            # NCHW f32


# --------------------------- params & reference ----------------------------- #

def init_params(key, cin, cout, same_shape):
    ks = jax.random.split(key, 8)
    p = {
        "w1": 0.1 * jax.random.normal(ks[0], (cout, cin, 3, 3), jnp.float32),
        "g1": 1.0 + 0.1 * jax.random.normal(ks[1], (cout,), jnp.float32),
        "b1": 0.1 * jax.random.normal(ks[2], (cout,), jnp.float32),
        "w2": 0.1 * jax.random.normal(ks[3], (cout, cout, 3, 3), jnp.float32),
        "g2": 1.0 + 0.1 * jax.random.normal(ks[4], (cout,), jnp.float32),
        "b2": 0.1 * jax.random.normal(ks[5], (cout,), jnp.float32),
    }
    if not same_shape:
        p["w3"] = 0.1 * jax.random.normal(ks[6], (cout, cin, 1, 1), jnp.float32)
        p["b3"] = 0.1 * jax.random.normal(ks[7], (cout,), jnp.float32)
    return p


def ref_forward(x_nchw, params, same_shape):
    """Pure-JAX reference (XLA convs) for correctness checking."""
    stride = 1 if same_shape else 2

    def conv(x, w, s, pad):
        return jax.lax.conv_general_dilated(
            x, w, (s, s), ((pad, pad), (pad, pad)),
            dimension_numbers=("NCHW", "OIHW", "NCHW"))

    def bn(y, g, b):
        m = jnp.mean(y, axis=(0, 2, 3), keepdims=True)
        v = jnp.mean(jnp.square(y - m), axis=(0, 2, 3), keepdims=True)
        return (y - m) / jnp.sqrt(v + BN_EPS) * g.reshape(1, -1, 1, 1) + b.reshape(1, -1, 1, 1)

    out = jnp.maximum(bn(conv(x_nchw, params["w1"], stride, 1), params["g1"], params["b1"]), 0.0)
    out = jnp.maximum(bn(conv(out, params["w2"], 1, 1), params["g2"], params["b2"]), 0.0)
    x = x_nchw
    if not same_shape:
        x = conv(x_nchw, params["w3"], stride, 0) + params["b3"].reshape(1, -1, 1, 1)
    return jnp.maximum(x + out, 0.0)


# ---------------------------------- main ------------------------------------ #

if __name__ == "__main__":
    key = jax.random.PRNGKey(0)
    kx, kp1, kp2 = jax.random.split(key, 3)

    # Case 1: same_shape=False  (stride-2 downsample with 1x1-conv shortcut)
    x = jax.random.normal(kx, (2, 4, 16, 16), jnp.float32)
    params = init_params(kp1, 4, 8, same_shape=False)
    y = jax.block_until_ready(residual_block_forward(x, params, same_shape=False))
    y_ref = ref_forward(x, params, same_shape=False)
    assert y.shape == (2, 8, 8, 8), y.shape
    assert float(jnp.max(jnp.abs(y - y_ref))) < 5e-2

    # Case 2: same_shape=True  (identity shortcut)
    x2 = jax.random.normal(kx, (2, 8, 16, 16), jnp.float32)
    params2 = init_params(kp2, 8, 8, same_shape=True)
    y2 = jax.block_until_ready(residual_block_forward(x2, params2, same_shape=True))
    y2_ref = ref_forward(x2, params2, same_shape=True)
    assert y2.shape == (2, 8, 16, 16), y2.shape
    assert float(jnp.max(jnp.abs(y2 - y2_ref))) < 5e-2

    print("KERNEL_OK")
</pallas_src>

<mosaic_0001>
module attributes {stable_mosaic.version = 11 : i64} {
  func.func @_matmul_stats_kernel(%arg0: i32, %arg1: memref<128x128xbf16, #tpu.memory_space<vmem>>, %arg2: memref<128x128xbf16, #tpu.memory_space<vmem>>, %arg3: memref<128x128xbf16, #tpu.memory_space<vmem>>, %arg4: memref<1x2x128xf32, #tpu.memory_space<vmem>>) attributes {dimension_semantics = [#tpu.dimension_semantics<parallel>], iteration_bounds = array<i64: 1>, scalar_prefetch = 0 : i64, scratch_operands = 0 : i64, tpu.core_type = #tpu.core_type<tc>, window_params = [{transform_indices = @transform_0, window_bounds = array<i64: 128, 128>}, {pipeline_mode = #tpu.pipeline_mode<synchronous>, transform_indices = @transform_1, window_bounds = array<i64: 128, 128>}, {transform_indices = @transform_2, window_bounds = array<i64: 128, 128>}, {transform_indices = @transform_3, window_bounds = array<i64: 1, 2, 128>}]} {
    %c0 = arith.constant 0 : index
    %c0_0 = arith.constant 0 : index
    %0 = vector.load %arg1[%c0, %c0_0] : memref<128x128xbf16, #tpu.memory_space<vmem>>, vector<128x128xbf16>
    %c0_1 = arith.constant 0 : index
    %c0_2 = arith.constant 0 : index
    %1 = vector.load %arg2[%c0_1, %c0_2] : memref<128x128xbf16, #tpu.memory_space<vmem>>, vector<128x128xbf16>
    %cst = arith.constant dense<0.000000e+00> : vector<128x128xf32>
    %2 = tpu.matmul %0, %1, %cst {dimension_numbers = #tpu.dot_dimension_numbers<[1], [0], [0], [1], [0, 0, 1, 1], [], []>} : vector<128x128xbf16>, vector<128x128xbf16>, vector<128x128xf32> -> vector<128x128xf32>
    %3 = arith.truncf %2 : vector<128x128xf32> to vector<128x128xbf16>
    %c0_3 = arith.constant 0 : index
    %c0_4 = arith.constant 0 : index
    %4 = vector.load %arg3[%c0_3, %c0_4] : memref<128x128xbf16, #tpu.memory_space<vmem>>, vector<128x128xbf16>
    tpu.vector_store %arg3[%c0_3, %c0_4], %3 {strides = array<i32>} : memref<128x128xbf16, #tpu.memory_space<vmem>>, vector<128x128xbf16>,
    %cst_5 = arith.constant dense<0.000000e+00> : vector<128xf32>
    %5 = vector.multi_reduction <add>, %2, %cst_5 [0] : vector<128x128xf32> to vector<128xf32>
    %6 = vector.shape_cast %5 : vector<128xf32> to vector<1x128xf32>
    %c0_6 = arith.constant 0 : index
    %c0_7 = arith.constant 0 : index
    %c0_8 = arith.constant 0 : index
    %7 = vector.load %arg4[%c0_6, %c0_7, %c0_8] : memref<1x2x128xf32, #tpu.memory_space<vmem>>, vector<1x1x128xf32>
    %8 = vector.shape_cast %7 : vector<1x1x128xf32> to vector<1x128xf32>
    %9 = vector.shape_cast %6 : vector<1x128xf32> to vector<1x1x128xf32>
    tpu.vector_store %arg4[%c0_6, %c0_7, %c0_8], %9 {strides = array<i32>} : memref<1x2x128xf32, #tpu.memory_space<vmem>>, vector<1x1x128xf32>,
    %10 = arith.mulf %2, %2 : vector<128x128xf32>
    %cst_9 = arith.constant dense<0.000000e+00> : vector<128xf32>
    %11 = vector.multi_reduction <add>, %10, %cst_9 [0] : vector<128x128xf32> to vector<128xf32>
    %12 = vector.shape_cast %11 : vector<128xf32> to vector<1x128xf32>
    %c0_10 = arith.constant 0 : index
    %c1 = arith.constant 1 : index
    %c0_11 = arith.constant 0 : index
    %13 = vector.load %arg4[%c0_10, %c1, %c0_11] : memref<1x2x128xf32, #tpu.memory_space<vmem>>, vector<1x1x128xf32>
    %14 = vector.shape_cast %13 : vector<1x1x128xf32> to vector<1x128xf32>
    %15 = vector.shape_cast %12 : vector<1x128xf32> to vector<1x1x128xf32>
    tpu.vector_store %arg4[%c0_10, %c1, %c0_11], %15 {strides = array<i32>} : memref<1x2x128xf32, #tpu.memory_space<vmem>>, vector<1x1x128xf32>,
    return
  }
  func.func @transform_0(%arg0: i32) -> (i32, i32) {
    %c0_i32 = arith.constant 0 : i32
    %c0_i32_0 = arith.constant 0 : i32
    return %arg0, %c0_i32 : i32, i32
  }
  func.func @transform_1(%arg0: i32) -> (i32, i32) {
    %c0_i32 = arith.constant 0 : i32
    %c0_i32_0 = arith.constant 0 : i32
    %c0_i32_1 = arith.constant 0 : i32
    return %c0_i32, %c0_i32_0 : i32, i32
  }
  func.func @transform_2(%arg0: i32) -> (i32, i32) {
    %c0_i32 = arith.constant 0 : i32
    %c0_i32_0 = arith.constant 0 : i32
    return %arg0, %c0_i32 : i32, i32
  }
  func.func @transform_3(%arg0: i32) -> (i32, i32, i32) {
    %c0_i32 = arith.constant 0 : i32
    %c0_i32_0 = arith.constant 0 : i32
    %c0_i32_1 = arith.constant 0 : i32
    return %arg0, %c0_i32, %c0_i32_0 : i32, i32, i32
  }
}

</mosaic_0001>

<bundles_post_ra>
// kernel: tpu_custom_call.1
= control target key start
LH: loop header
LB: loop body
LE: loop exit
PB: predicated region body
PF: predicated region fallthrough
CT: control target
= control target key end

     0   :  { %9 = vsyncpa [#allocation3], 0  ;;  %s825_s0 = inlined_call_operand.hbm [shape: bf16[128,128], index: 0, kind: input, shape index: {}]   ;;  %s826_s1 = inlined_call_operand.hbm [shape: bf16[128,128], index: 1, kind: input, shape index: {}]   ;;  %s827_s2 = inlined_call_operand.hbm [shape: bf16[128,128], index: 2, kind: output, shape index: {0}]   ;;  %s828_s3 = inlined_call_operand.hbm [shape: f32[1,2,128], index: 3, kind: output, shape index: {1}]  }
   0x1   :  { %10 = vsyncpa [#allocation6], 0 }
   0x2   :  { %11 = vsyncpa [#allocation4], 0 }
   0x3   :  { %12 = vsyncpa [#allocation9], 0  ;;  %s718_s12 = smov [#allocation2]   ;;  %s622_s16 = scalar_lea.hbm %s825_s0, 1024 }
   0x4   :  { %s18_s13 = sshll.u32 %s718_s12, 4  ;;  %p623_p0 = scmp.ne.s32.totalorder %s825_s0, %s622_s16  ;;  %s19_s13 = int_to_ptr.vmem [resolvable:$true] %s18_s13 }
   0x5   :  { %p626_p1 = scmp.lt.u32.totalorder %s622_s16, %s825_s0 }
   0x7   :  { %p628_p2 = pnand %p626_p1, %p623_p0 }
   0x9   :  { %631 = shalt.err (!%p628_p2)
}
   0xa   :  { %s632_s21 = scalar_lea.vmem %s19_s13, 1024  ;;  %p637_p4 = scmp.lt.s32.totalorder %s19_s13, %s19_s13 }
   0xb   :  { %p633_p3 = scmp.ne.s32.totalorder %s19_s13, %s632_s21  ;;  %p638_p5 = scmp.lt.s32.totalorder %s632_s21, %s632_s21 }
   0xd   :  { %p639_p6 = por %p638_p5, %p637_p4 }
   0xf   :  { %p640_p7 = pnand %p639_p6, %p633_p3 }
  0x11   :  { %643 = shalt.err (!%p640_p7)
}
  0x12   :  { %s719_s22 = smov 64   ;;  %s720_s23 = smov 4  }
  0x13   :  { %24 = dma.hbm_to_vmem [thread:$0]  %s825_s0, 1024, %s19_s13, [#allocation3], %s719_s22, %s719_s22, %s720_s23  }
  0x14   :  { %s721_s26 = smov [#allocation5]   ;;  %s644_s30 = scalar_lea.hbm %s826_s1, 1024 }
  0x15   :  { %s30_s27 = sshll.u32 %s721_s26, 4  ;;  %p645_p8 = scmp.ne.s32.totalorder %s826_s1, %s644_s30  ;;  %s31_s27 = int_to_ptr.vmem [resolvable:$true] %s30_s27 }
  0x16   :  { %p648_p9 = scmp.lt.u32.totalorder %s644_s30, %s826_s1 }
  0x18   :  { %p650_p10 = pnand %p648_p9, %p645_p8 }
  0x1a   :  { %653 = shalt.err (!%p650_p10)
}
  0x1b   :  { %s654_s8 = scalar_lea.vmem %s31_s27, 1024  ;;  %p659_p12 = scmp.lt.s32.totalorder %s31_s27, %s31_s27 }
  0x1c   :  { %p655_p11 = scmp.ne.s32.totalorder %s31_s27, %s654_s8  ;;  %p660_p13 = scmp.lt.s32.totalorder %s654_s8, %s654_s8 }
  0x1e   :  { %p661_p0 = por %p660_p13, %p659_p12 }
  0x20   :  { %p662_p1 = pnand %p661_p0, %p655_p11 }
  0x22   :  { %665 = shalt.err (!%p662_p1)
}
  0x23   :  { %36 = dma.hbm_to_vmem [thread:$0]  %s826_s1, 1024, %s31_s27, [#allocation6], %s719_s22, %s719_s22, %s720_s23  }
  0x24   :  { %710 = dma.done.wait [#allocation3], 1024  }
  0x25   :  { %711 = vsyncadd [#allocation3], 4294966272 }
  0x26   :  { %712 = dma.done.wait [#allocation6], 1024  }
  0x27   :  { %713 = vsyncadd [#allocation6], 4294966272  ;;  %v606_v0 = vld [vmem:[#allocation5] sm:$0xff]   ;;  %v607_v1 = vld [vmem:[#allocation5 + $0x8] sm:$0xff]   ;;  %s722_s1 = smov [#allocation7]  }
  0x28   :  { %552 = vmatprep.subr.bf16.mxu0 %v606_v0  ;;  %584 = vmatprep.subr.bf16.mxu1 %v606_v0  ;;  %v608_v2 = vld [vmem:[#allocation5 + $0x10] sm:$0xff]   ;;  %v609_v3 = vld [vmem:[#allocation5 + $0x18] sm:$0xff]   ;;  %v614_v4 = vld [vmem:[#allocation2] sm:$0xff]   ;;  %s414_s10 = sshll.u32 %s722_s1, 4  ;;  %s415_s10 = int_to_ptr.vmem [resolvable:$true] %s414_s10 }
  0x29   :  { %553 = vmatpush3.bf16.msra.mxu0 %v606_v0  ;;  %592 = vmatpush3.bf16.msra.mxu1 %v606_v0  ;;  %v610_v5 = vld [vmem:[#allocation5 + $0x20] sm:$0xff]   ;;  %v611_v7 = vld [vmem:[#allocation5 + $0x28] sm:$0xff]   ;;  %v612_v8 = vld [vmem:[#allocation5 + $0x30] sm:$0xff]   ;;  %s666_s11 = scalar_lea.vmem %s415_s10, 1024  ;;  %p671_p3 = scmp.lt.s32.totalorder %s415_s10, %s415_s10 }
  0x2a   :  { %554 = vmatprep.subr.bf16.mxu0 %v607_v1  ;;  %585 = vmatprep.subr.bf16.mxu1 %v607_v1  ;;  %v618_v6 = vld [vmem:[#allocation2 + $0x20] sm:$0xff]   ;;  %v613_v9 = vld [vmem:[#allocation5 + $0x38] sm:$0xff]   ;;  %v615_v10 = vld [vmem:[#allocation2 + $0x8] sm:$0xff]   ;;  %p667_p2 = scmp.ne.s32.totalorder %s415_s10, %s666_s11  ;;  %p672_p4 = scmp.lt.s32.totalorder %s666_s11, %s666_s11 }
  0x2b   :  { %568 = vmatprep.mubr.bf16.mxu0 %v614_v4  ;;  %576 = vmatprep.mubr.bf16.mxu1 %v618_v6  ;;  %v619_v11 = vld [vmem:[#allocation2 + $0x28] sm:$0xff]   ;;  %v616_v12 = vld [vmem:[#allocation2 + $0x10] sm:$0xff]   ;;  %v617_v14 = vld [vmem:[#allocation2 + $0x18] sm:$0xff]  }
  0x2c   :  { %v620_v13 = vld [vmem:[#allocation2 + $0x30] sm:$0xff]   ;;  %v621_v15 = vld [vmem:[#allocation2 + $0x38] sm:$0xff]   ;;  %p673_p5 = por %p672_p4, %p671_p3 }
  0x2d   :  { %555 = vmatpush3.bf16.msra.mxu0 %v607_v1  ;;  %593 = vmatpush3.bf16.msra.mxu1 %v607_v1 }
  0x2e   :  { %556 = vmatprep.subr.bf16.mxu0 %v608_v2  ;;  %586 = vmatprep.subr.bf16.mxu1 %v608_v2  ;;  %p674_p6 = pnand %p673_p5, %p667_p2 }
  0x31   :  { %557 = vmatpush3.bf16.msra.mxu0 %v608_v2  ;;  %594 = vmatpush3.bf16.msra.mxu1 %v608_v2 }
  0x32   :  { %558 = vmatprep.subr.bf16.mxu0 %v609_v3  ;;  %587 = vmatprep.subr.bf16.mxu1 %v609_v3 }
  0x35   :  { %559 = vmatpush3.bf16.msra.mxu0 %v609_v3  ;;  %595 = vmatpush3.bf16.msra.mxu1 %v609_v3 }
  0x36   :  { %560 = vmatprep.subr.bf16.mxu0 %v610_v5  ;;  %588 = vmatprep.subr.bf16.mxu1 %v610_v5 }
  0x39   :  { %561 = vmatpush3.bf16.msra.mxu0 %v610_v5  ;;  %596 = vmatpush3.bf16.msra.mxu1 %v610_v5 }
  0x3a   :  { %562 = vmatprep.subr.bf16.mxu0 %v611_v7  ;;  %589 = vmatprep.subr.bf16.mxu1 %v611_v7 }
  0x3d   :  { %563 = vmatpush3.bf16.msra.mxu0 %v611_v7  ;;  %597 = vmatpush3.bf16.msra.mxu1 %v611_v7 }
  0x3e   :  { %564 = vmatprep.subr.bf16.mxu0 %v612_v8  ;;  %590 = vmatprep.subr.bf16.mxu1 %v612_v8 }
  0x41   :  { %565 = vmatpush3.bf16.msra.mxu0 %v612_v8  ;;  %598 = vmatpush3.bf16.msra.mxu1 %v612_v8 }
  0x42   :  { %566 = vmatprep.subr.bf16.mxu0 %v613_v9  ;;  %591 = vmatprep.subr.bf16.mxu1 %v613_v9 }
  0x45   :  { %567 = vmatpush3.bf16.msra.mxu0 %v613_v9  ;;  %599 = vmatpush3.bf16.msra.mxu1 %v613_v9 }
  0x48   :  { %569 = vmatmul.mubr.bf16.vlgmr.msra.gmra.mrb[0].mxu0 %v615_v10  ;;  %577 = vmatmul.mubr.bf16.vlgmr.msra.gmra.mrb[0].mxu1 %v619_v11 }
  0x49   :  { %572 = vmatprep.mubr.bf16.mxu0 %v616_v12  ;;  %580 = vmatprep.mubr.bf16.mxu1 %v620_v13 }
  0x50   :  { %573 = vmatmul.mubr.bf16.gmra.mrb[4].mxu0 %v617_v14  ;;  %581 = vmatmul.mubr.bf16.gmra.mrb[4].mxu1 %v621_v15 }
 0x11b   :  { %v570_v16 = vpop.f32.mrb[0].mxu0  ;;  %v774_v17 = vpop.f32.mrb[0].mxu1 }
 0x11c   :  { %v206_v18 = vpop.f32.mrb[1].mxu0  ;;  %v776_v19 = vpop.f32.mrb[1].mxu1  ;;  %v373_v31 = vmul.f32 %v570_v16, %v570_v16 }
 0x11d   :  { %v571_v20 = vpop.f32.mrb[2].mxu0  ;;  %v778_v21 = vpop.f32.mrb[2].mxu1  ;;  %v371_v22 = vmul.f32 %v206_v18, %v206_v18  ;;  %v379_v61 = vmul.f32 %v776_v19, %v776_v19 }
 0x11e   :  { %v497_v23 = vpack.c.bf16 %v571_v20, %v570_v16  ;;  %v209_v24 = vpop.f32.mrb[3].mxu0  ;;  %v517_v25 = vpack.c.bf16 %v778_v21, %v774_v17  ;;  %v782_v26 = vpop.f32.mrb[3].mxu1  ;;  %v374_v34 = vmul.f32 %v571_v20, %v571_v20 }
 0x11f   :  { %v492_v27 = vpack.c.bf16 %v209_v24, %v206_v18  ;;  %v349_v28 = vadd.f32 %v209_v24, %v206_v18  ;;  %v372_v29 = vmul.f32 %v209_v24, %v209_v24  ;;  %v512_v30 = vpack.c.bf16 %v782_v26, %v776_v19 }
 0x120   :  { %529 = vst [vmem:[#allocation7 + $0x8] sm:$0xff] %v497_v23   ;;  %533 = vst [vmem:[#allocation7 + $0x28] sm:$0xff] %v517_v25  }
 0x121   :  { %493 = vst [vmem:[#allocation7] sm:$0xff] %v492_v27   ;;  %v350_v32 = vadd.f32 %v570_v16, %v349_v28  ;;  %v387_v33 = vadd.f32 %v372_v29, %v371_v22  ;;  %532 = vst [vmem:[#allocation7 + $0x20] sm:$0xff] %v512_v30  }
 0x123   :  { %v388_v35 = vadd.f32 %v387_v33, %v373_v31  ;;  %v574_v36 = vpop.f32.mrb[4].mxu0  ;;  %v351_v37 = vadd.f32 %v571_v20, %v350_v32  ;;  %v582_v38 = vpop.f32.mrb[4].mxu1 }
 0x124   :  { %v222_v39 = vpop.f32.mrb[5].mxu0  ;;  %v254_v40 = vpop.f32.mrb[5].mxu1  ;;  %v377_v55 = vmul.f32 %v574_v36, %v574_v36 }
 0x125   :  { %v352_v41 = vadd.f32 %v351_v37, %v222_v39  ;;  %v375_v42 = vmul.f32 %v222_v39, %v222_v39  ;;  %v389_v43 = vadd.f32 %v388_v35, %v374_v34  ;;  %v575_v44 = vpop.f32.mrb[6].mxu0  ;;  %v583_v45 = vpop.f32.mrb[6].mxu1 }
 0x126   :  { %v507_v46 = vpack.c.bf16 %v575_v44, %v574_v36  ;;  %v225_v47 = vpop.f32.mrb[7].mxu0  ;;  %v527_v48 = vpack.c.bf16 %v583_v45, %v582_v38  ;;  %v257_v49 = vpop.f32.mrb[7].mxu1  ;;  %v378_v58 = vmul.f32 %v575_v44, %v575_v44 }
 0x127   :  { %v390_v50 = vadd.f32 %v389_v43, %v375_v42  ;;  %v502_v51 = vpack.c.bf16 %v225_v47, %v222_v39  ;;  %v353_v52 = vadd.f32 %v352_v41, %v225_v47  ;;  %v376_v53 = vmul.f32 %v225_v47, %v225_v47 }
 0x128   :  { %531 = vst [vmem:[#allocation7 + $0x18] sm:$0xff] %v507_v46   ;;  %535 = vst [vmem:[#allocation7 + $0x38] sm:$0xff] %v527_v48   ;;  %v522_v54 = vpack.c.bf16 %v257_v49, %v254_v40 }
 0x129   :  { %530 = vst [vmem:[#allocation7 + $0x10] sm:$0xff] %v502_v51   ;;  %v354_v56 = vadd.f32 %v574_v36, %v353_v52  ;;  %v391_v57 = vadd.f32 %v390_v50, %v376_v53 }
 0x12a   :  { %534 = vst [vmem:[#allocation7 + $0x30] sm:$0xff] %v522_v54  }
 0x12b   :  { %v392_v59 = vadd.f32 %v391_v57, %v377_v55  ;;  %v355_v60 = vadd.f32 %v575_v44, %v354_v56 }
 0x12c   :  { %677 = shalt.err (!%p674_p6)
}
 0x12d   :  { %s678_s14 = scalar_lea.hbm %s827_s2, 1024 }
 0x12e   :  { %p679_p7 = scmp.ne.s32.totalorder %s827_s2, %s678_s14  ;;  %p682_p8 = scmp.lt.u32.totalorder %s678_s14, %s827_s2 }
 0x130   :  { %p684_p9 = pnand %p682_p8, %p679_p7 }
 0x132   :  { %687 = shalt.err (!%p684_p9)
}
 0x133   :  { %420 = dma.vmem_to_hbm [thread:$0]  %s415_s10, 1024, %s827_s2, [#allocation4], %s719_s22, %s719_s22, %s720_s23   ;;  %v356_v62 = vadd.f32 %v355_v60, %v776_v19  ;;  %v393_v63 = vadd.f32 %v392_v59, %v378_v58  ;;  %v380_v2 = vmul.f32 %v782_v26, %v782_v26  ;;  %v381_v3 = vmul.f32 %v774_v17, %v774_v17 }
 0x134   :  { %v382_v6 = vmul.f32 %v778_v21, %v778_v21  ;;  %v383_v9 = vmul.f32 %v254_v40, %v254_v40  ;;  %v384_v14 = vmul.f32 %v257_v49, %v257_v49  ;;  %v385_v15 = vmul.f32 %v582_v38, %v582_v38  ;;  %s723_s2 = smov [#allocation8]  }
 0x135   :  { %v394_v0 = vadd.f32 %v393_v63, %v379_v61  ;;  %v357_v1 = vadd.f32 %v356_v62, %v782_v26  ;;  %v386_v19 = vmul.f32 %v583_v45, %v583_v45  ;;  %s427_s21 = sshll.u32 %s723_s2, 4  ;;  %s428_s21 = int_to_ptr.vmem [resolvable:$true] %s427_s21 }
 0x136   :  { %s688_s22 = scalar_lea.vmem %s428_s21, 32  ;;  %p693_p11 = scmp.lt.s32.totalorder %s428_s21, %s428_s21 }
 0x137   :  { %v358_v4 = vadd.f32 %v774_v17, %v357_v1  ;;  %v395_v5 = vadd.f32 %v394_v0, %v380_v2  ;;  %p689_p10 = scmp.ne.s32.totalorder %s428_s21, %s688_s22  ;;  %p694_p12 = scmp.lt.s32.totalorder %s688_s22, %s688_s22 }
 0x139   :  { %v396_v7 = vadd.f32 %v395_v5, %v381_v3  ;;  %v359_v8 = vadd.f32 %v778_v21, %v358_v4  ;;  %p695_p13 = por %p694_p12, %p693_p11 }
 0x13b   :  { %v360_v10 = vadd.f32 %v359_v8, %v254_v40  ;;  %v397_v11 = vadd.f32 %v396_v7, %v382_v6  ;;  %p696_p0 = pnand %p695_p13, %p689_p10 }
 0x13d   :  { %v398_v12 = vadd.f32 %v397_v11, %v383_v9  ;;  %v361_v13 = vadd.f32 %v360_v10, %v257_v49 }
 0x13f   :  { %v362_v16 = vadd.f32 %v582_v38, %v361_v13  ;;  %v399_v18 = vadd.f32 %v398_v12, %v384_v14 }
 0x141   :  { %v363_v20 = vadd.f32 %v583_v45, %v362_v16  ;;  %v400_v22 = vadd.f32 %v399_v18, %v385_v15 }
 0x143   :  { %v364_v17 = vrot.slane %v363_v20, 4  ;;  %v401_v23 = vadd.f32 %v400_v22, %v386_v19 }
 0x145   :  { %v365_v24 = vadd.f32 %v364_v17, %v363_v20  ;;  %v402_v25 = vrot.slane %v401_v23, 4 }
 0x147   :  { %v366_v26 = vrot.slane %v365_v24, 2  ;;  %v403_v27 = vadd.f32 %v402_v25, %v401_v23 }
 0x149   :  { %v367_v28 = vadd.f32 %v366_v26, %v365_v24  ;;  %v404_v21 = vrot.slane %v403_v27, 2 }
 0x14b   :  { %v368_v29 = vrot.slane %v367_v28, 1  ;;  %v405_v30 = vadd.f32 %v404_v21, %v403_v27 }
 0x14d   :  { %v369_v31 = vadd.f32 %v368_v29, %v367_v28  ;;  %v406_v32 = vrot.slane %v405_v30, 1 }
 0x14f   :  { %370 = vst [vmem:[#allocation8] sm:$0x1] %v369_v31  ;;  %v407_v33 = vadd.f32 %v406_v32, %v405_v30 }
 0x151   :  { %408 = vst [vmem:[#allocation8 + $0x1] sm:$0x1] %v407_v33 }
 0x152   :  { %699 = shalt.err (!%p696_p0)
}
 0x153   :  { %s700_s25 = scalar_lea.hbm %s828_s3, 32 }
 0x154   :  { %p701_p1 = scmp.ne.s32.totalorder %s828_s3, %s700_s25  ;;  %p704_p2 = scmp.lt.u32.totalorder %s700_s25, %s828_s3 }
 0x156   :  { %p706_p3 = pnand %p704_p2, %p701_p1 }
 0x158   :  { %709 = shalt.err (!%p706_p3)
}
 0x159   :  { %430 = dma.vmem_to_hbm [thread:$0]  %s428_s21, 32, %s828_s3, [#allocation9]  }
 0x15a   :  { %714 = dma.done.wait [#allocation4], 1024  }
 0x15b   :  { %715 = vsyncadd [#allocation4], 4294966272 }
 0x15c   :  { %716 = dma.done.wait [#allocation9], 32  }
 0x15d   :  { %717 = vsyncadd [#allocation9], 4294967264 }
 0x15e   :  { %437 = vsyncpa [#allocation3], 1 }
 0x15f   :  { %438 = vsyncpa [#allocation6], 1 }
 0x160   :  { %439 = vsyncpa [#allocation4], 1 }
 0x161   :  { %440 = vsyncpa [#allocation9], 1 }

</bundles_post_ra>
